<compile_context>
chip_gen: v7x
topology: tpu7x:2x2x1
jax: 0.10.0
libtpu: 0.0.40
codegen_flags: <defaults>
</compile_context>

<pallas_src>
import functools

import jax
import jax.numpy as jnp
from jax.experimental import pallas as pl
from jax.experimental.pallas import tpu as pltpu

_LANES = 128
_SUBLANES = 8
_MAX_BLOCK_ROWS = 8192          # 8192 * 128 * 4 B = 4 MiB per f32 input tile
_VMEM_LIMIT_BYTES = 32 << 20    # raises v5e's 16 MiB scoped default; == default on v6e/v7x
_PAD_LOGIT = -1e4               # sigmoid(-1e4) == 0 and log1p(exp(-1e4)) == 0 -> neutral


def _round_up(x, m):
    return ((x + m - 1) // m) * m


@functools.lru_cache(maxsize=None)
def _tensorcores_per_chip():
    """Best-effort TensorCores per chip: 2 on v7x, else 1.  Never raises."""
    try:
        info = pltpu.get_tpu_info()
        for attr in ("num_cores", "core_count", "cores_per_chip",
                     "num_tensorcores", "tensorcore_count"):
            v = getattr(info, attr, None)
            if isinstance(v, int) and v > 0:
                return v
    except Exception:
        pass
    try:
        kind = jax.devices()[0].device_kind.lower()
        if "v7" in kind:
            return 2
    except Exception:
        pass
    return 1


def _bce_dice_kernel(pr_ref, gt_ref, out_ref, acc_ref, *,
                     block_rows, inner_steps, valid_rows, need_mask):
    c = pl.program_id(0)   # parallel chunk axis (megacore on v7x)
    i = pl.program_id(1)   # arbitrary (reduction) axis

    @pl.when(i == 0)
    def _():
        acc_ref[...] = jnp.zeros_like(acc_ref)

    x = pr_ref[...].astype(jnp.float32)   # (block_rows, 128) logits
    y = gt_ref[...].astype(jnp.float32)   # (block_rows, 128) targets

    def fold(v):
        # (block_rows, 128) -> (8, 128): tile-preserving reshape + plain full-vreg
        # VPU adds over the leading axis.  No XLU sublane reduce per step.
        return jnp.sum(v.reshape(block_rows // _SUBLANES, _SUBLANES, _LANES), axis=0)

    def accumulate(xv, yv):
        e = jnp.exp(-jnp.abs(xv))                              # shared: sigmoid + stable BCE
        p = jnp.where(xv >= 0, 1.0, e) / (1.0 + e)             # sigmoid(xv), exact divide
        bce = jnp.maximum(xv, 0.0) - xv * yv + jnp.log1p(e)    # elementwise BCEWithLogits
        acc_ref[0] += fold(yv * p)   # tp
        acc_ref[1] += fold(p)        # sum(sigmoid(pr))
        acc_ref[2] += fold(yv)       # sum(gt)
        acc_ref[3] += fold(bce)      # sum of elementwise BCE

    if need_mask:
        row0 = (c * inner_steps + i) * block_rows
        # Boundary = partial last block OR clamped duplicate block of an over-provisioned
        # grid.  Only boundary blocks pay for the iota/compare/selects.
        boundary = row0 + block_rows > valid_rows

        @pl.when(jnp.logical_not(boundary))
        def _():
            accumulate(x, y)

        @pl.when(boundary)
        def _():
            rid = row0 + jax.lax.broadcasted_iota(jnp.int32, (block_rows, _LANES), 0)
            valid = rid < valid_rows
            accumulate(jnp.where(valid, x, _PAD_LOGIT), jnp.where(valid, y, 0.0))
    else:
        accumulate(x, y)

    @pl.when(i == pl.num_programs(1) - 1)
    def _():
        out_ref[0] = acc_ref[...]


def _partial_sums_dense(x, y):
    """Plain-JAX [tp, sum(p), sum(gt), sum(bce)] for the tiny (<128 elem) tail."""
    x = x.astype(jnp.float32)
    y = y.astype(jnp.float32)
    e = jnp.exp(-jnp.abs(x))
    p = jnp.where(x >= 0, 1.0, e) / (1.0 + e)
    bce = jnp.maximum(x, 0.0) - x * y + jnp.log1p(e)
    return jnp.stack([jnp.sum(y * p), jnp.sum(p), jnp.sum(y), jnp.sum(bce)])


@functools.partial(jax.jit, static_argnames=("eps", "lambda_dice", "lambda_bce"))
def bce_dice_loss(y_pr, y_gt, eps=1e-7, lambda_dice=1.0, lambda_bce=1.0):
    """Equivalent of BCEDiceLoss(activation='sigmoid').forward(y_pr, y_gt)."""
    n = y_pr.size
    pr_flat = y_pr.reshape(-1)   # keep original dtype; the kernel casts per tile
    gt_flat = y_gt.reshape(-1)

    n_main = (n // _LANES) * _LANES
    n_tail = n - n_main

    sums = jnp.zeros((4,), jnp.float32)

    if n_main:
        # 128-aligned prefix -> zero-copy lane-dense view when n is already aligned.
        pr_main = pr_flat if n_tail == 0 else pr_flat[:n_main]
        gt_main = gt_flat if n_tail == 0 else gt_flat[:n_main]
        rows = n_main // _LANES
        pr2 = pr_main.reshape(rows, _LANES)
        gt2 = gt_main.reshape(rows, _LANES)

        block_rows = min(_MAX_BLOCK_ROWS, _round_up(rows, _SUBLANES))
        num_blocks = -(-rows // block_rows)
        # Split into 2 chunks only where the "parallel" axis actually shards across
        # TensorCores (v7x); on 1-TC chips it would just duplicate a clamped block.
        num_chunks = 2 if (_tensorcores_per_chip() >= 2 and num_blocks >= 2) else 1
        inner_steps = -(-num_blocks // num_chunks)
        need_mask = (num_chunks * inner_steps * block_rows) != rows

        kernel = functools.partial(
            _bce_dice_kernel,
            block_rows=block_rows,
            inner_steps=inner_steps,
            valid_rows=rows,
            need_mask=need_mask,
        )

        def in_map(c, i):
            # Clamp so an over-provisioned grid never indexes past the array; the gated
            # in-kernel row mask zeroes any duplicated / partial block contribution.
            return (jnp.minimum(c * inner_steps + i, num_blocks - 1), 0)

        bytes_accessed = n_main * (pr2.dtype.itemsize + gt2.dtype.itemsize)
        cost = pl.CostEstimate(flops=12 * n_main, transcendentals=2 * n_main,
                               bytes_accessed=bytes_accessed)

        partials = pl.pallas_call(
            kernel,
            out_shape=jax.ShapeDtypeStruct((num_chunks, 4, _SUBLANES, _LANES), jnp.float32),
            grid_spec=pltpu.PrefetchScalarGridSpec(
                num_scalar_prefetch=0,
                grid=(num_chunks, inner_steps),
                in_specs=[
                    pl.BlockSpec((block_rows, _LANES), in_map),
                    pl.BlockSpec((block_rows, _LANES), in_map),
                ],
                out_specs=pl.BlockSpec((1, 4, _SUBLANES, _LANES),
                                       lambda c, i: (c, 0, 0, 0)),
                scratch_shapes=[pltpu.VMEM((4, _SUBLANES, _LANES), jnp.float32)],
            ),
            compiler_params=pltpu.CompilerParams(
                dimension_semantics=("parallel", "arbitrary"),
                vmem_limit_bytes=_VMEM_LIMIT_BYTES,
            ),
            cost_estimate=cost,
        )(pr2, gt2)

        sums = sums + jnp.sum(partials, axis=(0, 2, 3))   # tiny final reduce in plain JAX

    if n_tail:
        sums = sums + _partial_sums_dense(pr_flat[n_main:], gt_flat[n_main:])

    tp, sum_p, sum_g, bce_sum = sums[0], sums[1], sums[2], sums[3]
    fp = sum_p - tp
    fn = sum_g - tp
    # beta = 1  ->  (1 + beta^2) = 2
    score = (2.0 * tp + eps) / (2.0 * tp + fn + fp + eps)
    dice = 1.0 - score
    bce = bce_sum / n
    return lambda_dice * dice + lambda_bce * bce


def _reference_loss(y_pr, y_gt, eps=1e-7, lambda_dice=1.0, lambda_bce=1.0):
    """Pure-JAX reference mirroring the PyTorch module semantics."""
    x = y_pr.astype(jnp.float32)
    y = y_gt.astype(jnp.float32)
    p = jax.nn.sigmoid(x)
    tp = jnp.sum(y * p)
    fp = jnp.sum(p) - tp
    fn = jnp.sum(y) - tp
    score = (2.0 * tp + eps) / (2.0 * tp + fn + fp + eps)
    dice = 1.0 - score
    bce = jnp.mean(jnp.maximum(x, 0.0) - x * y + jnp.log1p(jnp.exp(-jnp.abs(x))))
    return lambda_dice * dice + lambda_bce * bce


if __name__ == "__main__":
    key = jax.random.PRNGKey(0)
    k1, k2 = jax.random.split(key)

    # NCHW logits and binary ground-truth mask (segmentation-style inputs).
    shape = (2, 4, 16, 16)
    y_pr = jax.random.normal(k1, shape, dtype=jnp.float32) * 2.0
    y_gt = (jax.random.uniform(k2, shape, dtype=jnp.float32) > 0.5).astype(jnp.float32)

    out = bce_dice_loss(y_pr, y_gt)
    out = jax.block_until_ready(out)

    ref = _reference_loss(y_pr, y_gt)
    assert jnp.allclose(out, ref, rtol=1e-5, atol=1e-5), (out, ref)

    print("KERNEL_OK")
</pallas_src>

<mosaic_0001>
module attributes {stable_mosaic.version = 11 : i64} {
  func.func @_bce_dice_kernel(%arg0: i32, %arg1: i32, %arg2: memref<16x128xf32, #tpu.memory_space<vmem>>, %arg3: memref<16x128xf32, #tpu.memory_space<vmem>>, %arg4: memref<1x4x8x128xf32, #tpu.memory_space<vmem>>, %arg5: memref<4x8x128xf32, #tpu.memory_space<vmem>>) attributes {dimension_semantics = [#tpu.dimension_semantics<parallel>, #tpu.dimension_semantics<arbitrary>], iteration_bounds = array<i64: 1, 1>, scalar_prefetch = 0 : i64, scratch_operands = 1 : i64, tpu.core_type = #tpu.core_type<tc>, window_params = [{transform_indices = @transform_0, window_bounds = array<i64: 16, 128>}, {transform_indices = @transform_1, window_bounds = array<i64: 16, 128>}, {transform_indices = @transform_2, window_bounds = array<i64: 1, 4, 8, 128>}]} {
    %c0_i32 = arith.constant 0 : i32
    %0 = arith.cmpi eq, %arg1, %c0_i32 : i32
    %1 = arith.extui %0 : i1 to i32
    %c0_i32_0 = arith.constant 0 : i32
    %2 = arith.cmpi ne, %1, %c0_i32_0 : i32
    scf.if %2 {
      %cst_35 = arith.constant 0.000000e+00 : f32
      %58 = vector.broadcast %cst_35 : f32 to vector<4x8x128xf32>
      %c0_36 = arith.constant 0 : index
      %c0_37 = arith.constant 0 : index
      %c0_38 = arith.constant 0 : index
      %59 = vector.load %arg5[%c0_36, %c0_37, %c0_38] : memref<4x8x128xf32, #tpu.memory_space<vmem>>, vector<4x8x128xf32>
      tpu.vector_store %arg5[%c0_36, %c0_37, %c0_38], %58 {strides = array<i32>} : memref<4x8x128xf32, #tpu.memory_space<vmem>>, vector<4x8x128xf32>,
    } else {
    }
    %c0 = arith.constant 0 : index
    %c0_1 = arith.constant 0 : index
    %3 = vector.load %arg2[%c0, %c0_1] : memref<16x128xf32, #tpu.memory_space<vmem>>, vector<16x128xf32>
    %c0_2 = arith.constant 0 : index
    %c0_3 = arith.constant 0 : index
    %4 = vector.load %arg3[%c0_2, %c0_3] : memref<16x128xf32, #tpu.memory_space<vmem>>, vector<16x128xf32>
    %5 = math.absf %3 : vector<16x128xf32>
    %cst = arith.constant 0.000000e+00 : f32
    %6 = vector.broadcast %cst : f32 to vector<16x128xf32>
    %7 = arith.subf %6, %5 : vector<16x128xf32>
    %8 = math.exp %7 : vector<16x128xf32>
    %cst_4 = arith.constant 0.000000e+00 : f32
    %9 = vector.broadcast %cst_4 : f32 to vector<16x128xf32>
    %10 = arith.cmpf oge, %3, %9 : vector<16x128xf32>
    %cst_5 = arith.constant 1.000000e+00 : f32
    %11 = vector.broadcast %cst_5 : f32 to vector<16x128xf32>
    %12 = arith.select %10, %11, %8 : vector<16x128xi1>, vector<16x128xf32>
    %cst_6 = arith.constant 1.000000e+00 : f32
    %13 = vector.broadcast %cst_6 : f32 to vector<16x128xf32>
    %14 = arith.addf %13, %8 : vector<16x128xf32>
    %15 = arith.divf %12, %14 : vector<16x128xf32>
    %cst_7 = arith.constant 0.000000e+00 : f32
    %16 = vector.broadcast %cst_7 : f32 to vector<16x128xf32>
    %17 = arith.maximumf %3, %16 : vector<16x128xf32>
    %18 = arith.mulf %3, %4 : vector<16x128xf32>
    %19 = arith.subf %17, %18 : vector<16x128xf32>
    %20 = math.log1p %8 : vector<16x128xf32>
    %21 = arith.addf %19, %20 : vector<16x128xf32>
    %c0_8 = arith.constant 0 : index
    %c0_9 = arith.constant 0 : index
    %c0_10 = arith.constant 0 : index
    %22 = vector.load %arg5[%c0_8, %c0_9, %c0_10] : memref<4x8x128xf32, #tpu.memory_space<vmem>>, vector<1x8x128xf32>
    %23 = vector.shape_cast %22 : vector<1x8x128xf32> to vector<8x128xf32>
    %24 = arith.mulf %4, %15 : vector<16x128xf32>
    %25 = vector.shape_cast %24 : vector<16x128xf32> to vector<2x8x128xf32>
    %cst_11 = arith.constant dense<0.000000e+00> : vector<8x128xf32>
    %26 = vector.multi_reduction <add>, %25, %cst_11 [0] : vector<2x8x128xf32> to vector<8x128xf32>
    %27 = arith.addf %23, %26 : vector<8x128xf32>
    %c0_12 = arith.constant 0 : index
    %c0_13 = arith.constant 0 : index
    %c0_14 = arith.constant 0 : index
    %28 = vector.load %arg5[%c0_12, %c0_13, %c0_14] : memref<4x8x128xf32, #tpu.memory_space<vmem>>, vector<1x8x128xf32>
    %29 = vector.shape_cast %28 : vector<1x8x128xf32> to vector<8x128xf32>
    %30 = vector.shape_cast %27 : vector<8x128xf32> to vector<1x8x128xf32>
    tpu.vector_store %arg5[%c0_12, %c0_13, %c0_14], %30 {strides = array<i32>} : memref<4x8x128xf32, #tpu.memory_space<vmem>>, vector<1x8x128xf32>,
    %c1 = arith.constant 1 : index
    %c0_15 = arith.constant 0 : index
    %c0_16 = arith.constant 0 : index
    %31 = vector.load %arg5[%c1, %c0_15, %c0_16] : memref<4x8x128xf32, #tpu.memory_space<vmem>>, vector<1x8x128xf32>
    %32 = vector.shape_cast %31 : vector<1x8x128xf32> to vector<8x128xf32>
    %33 = vector.shape_cast %15 : vector<16x128xf32> to vector<2x8x128xf32>
    %cst_17 = arith.constant dense<0.000000e+00> : vector<8x128xf32>
    %34 = vector.multi_reduction <add>, %33, %cst_17 [0] : vector<2x8x128xf32> to vector<8x128xf32>
    %35 = arith.addf %32, %34 : vector<8x128xf32>
    %c1_18 = arith.constant 1 : index
    %c0_19 = arith.constant 0 : index
    %c0_20 = arith.constant 0 : index
    %36 = vector.load %arg5[%c1_18, %c0_19, %c0_20] : memref<4x8x128xf32, #tpu.memory_space<vmem>>, vector<1x8x128xf32>
    %37 = vector.shape_cast %36 : vector<1x8x128xf32> to vector<8x128xf32>
    %38 = vector.shape_cast %35 : vector<8x128xf32> to vector<1x8x128xf32>
    tpu.vector_store %arg5[%c1_18, %c0_19, %c0_20], %38 {strides = array<i32>} : memref<4x8x128xf32, #tpu.memory_space<vmem>>, vector<1x8x128xf32>,
    %c2 = arith.constant 2 : index
    %c0_21 = arith.constant 0 : index
    %c0_22 = arith.constant 0 : index
    %39 = vector.load %arg5[%c2, %c0_21, %c0_22] : memref<4x8x128xf32, #tpu.memory_space<vmem>>, vector<1x8x128xf32>
    %40 = vector.shape_cast %39 : vector<1x8x128xf32> to vector<8x128xf32>
    %41 = vector.shape_cast %4 : vector<16x128xf32> to vector<2x8x128xf32>
    %cst_23 = arith.constant dense<0.000000e+00> : vector<8x128xf32>
    %42 = vector.multi_reduction <add>, %41, %cst_23 [0] : vector<2x8x128xf32> to vector<8x128xf32>
    %43 = arith.addf %40, %42 : vector<8x128xf32>
    %c2_24 = arith.constant 2 : index
    %c0_25 = arith.constant 0 : index
    %c0_26 = arith.constant 0 : index
    %44 = vector.load %arg5[%c2_24, %c0_25, %c0_26] : memref<4x8x128xf32, #tpu.memory_space<vmem>>, vector<1x8x128xf32>
    %45 = vector.shape_cast %44 : vector<1x8x128xf32> to vector<8x128xf32>
    %46 = vector.shape_cast %43 : vector<8x128xf32> to vector<1x8x128xf32>
    tpu.vector_store %arg5[%c2_24, %c0_25, %c0_26], %46 {strides = array<i32>} : memref<4x8x128xf32, #tpu.memory_space<vmem>>, vector<1x8x128xf32>,
    %c3 = arith.constant 3 : index
    %c0_27 = arith.constant 0 : index
    %c0_28 = arith.constant 0 : index
    %47 = vector.load %arg5[%c3, %c0_27, %c0_28] : memref<4x8x128xf32, #tpu.memory_space<vmem>>, vector<1x8x128xf32>
    %48 = vector.shape_cast %47 : vector<1x8x128xf32> to vector<8x128xf32>
    %49 = vector.shape_cast %21 : vector<16x128xf32> to vector<2x8x128xf32>
    %cst_29 = arith.constant dense<0.000000e+00> : vector<8x128xf32>
    %50 = vector.multi_reduction <add>, %49, %cst_29 [0] : vector<2x8x128xf32> to vector<8x128xf32>
    %51 = arith.addf %48, %50 : vector<8x128xf32>
    %c3_30 = arith.constant 3 : index
    %c0_31 = arith.constant 0 : index
    %c0_32 = arith.constant 0 : index
    %52 = vector.load %arg5[%c3_30, %c0_31, %c0_32] : memref<4x8x128xf32, #tpu.memory_space<vmem>>, vector<1x8x128xf32>
    %53 = vector.shape_cast %52 : vector<1x8x128xf32> to vector<8x128xf32>
    %54 = vector.shape_cast %51 : vector<8x128xf32> to vector<1x8x128xf32>
    tpu.vector_store %arg5[%c3_30, %c0_31, %c0_32], %54 {strides = array<i32>} : memref<4x8x128xf32, #tpu.memory_space<vmem>>, vector<1x8x128xf32>,
    %c0_i32_33 = arith.constant 0 : i32
    %55 = arith.cmpi eq, %arg1, %c0_i32_33 : i32
    %56 = arith.extui %55 : i1 to i32
    %c0_i32_34 = arith.constant 0 : i32
    %57 = arith.cmpi ne, %56, %c0_i32_34 : i32
    scf.if %57 {
      %c0_35 = arith.constant 0 : index
      %c0_36 = arith.constant 0 : index
      %c0_37 = arith.constant 0 : index
      %58 = vector.load %arg5[%c0_35, %c0_36, %c0_37] : memref<4x8x128xf32, #tpu.memory_space<vmem>>, vector<4x8x128xf32>
      %c0_38 = arith.constant 0 : index
      %c0_39 = arith.constant 0 : index
      %c0_40 = arith.constant 0 : index
      %c0_41 = arith.constant 0 : index
      %59 = vector.load %arg4[%c0_38, %c0_39, %c0_40, %c0_41] : memref<1x4x8x128xf32, #tpu.memory_space<vmem>>, vector<1x4x8x128xf32>
      %60 = vector.shape_cast %59 : vector<1x4x8x128xf32> to vector<4x8x128xf32>
      %61 = vector.shape_cast %58 : vector<4x8x128xf32> to vector<1x4x8x128xf32>
      tpu.vector_store %arg4[%c0_38, %c0_39, %c0_40, %c0_41], %61 {strides = array<i32>} : memref<1x4x8x128xf32, #tpu.memory_space<vmem>>, vector<1x4x8x128xf32>,
    } else {
    }
    return
  }
  func.func @transform_0(%arg0: i32, %arg1: i32) -> (i32, i32) {
    %c1_i32 = arith.constant 1 : i32
    %0 = arith.muli %arg0, %c1_i32 : i32
    %1 = arith.addi %0, %arg1 : i32
    %c0_i32 = arith.constant 0 : i32
    %2 = arith.minsi %1, %c0_i32 : i32
    %c0_i32_0 = arith.constant 0 : i32
    %c0_i32_1 = arith.constant 0 : i32
    return %2, %c0_i32_0 : i32, i32
  }
  func.func @transform_1(%arg0: i32, %arg1: i32) -> (i32, i32) {
    %c1_i32 = arith.constant 1 : i32
    %0 = arith.muli %arg0, %c1_i32 : i32
    %1 = arith.addi %0, %arg1 : i32
    %c0_i32 = arith.constant 0 : i32
    %2 = arith.minsi %1, %c0_i32 : i32
    %c0_i32_0 = arith.constant 0 : i32
    %c0_i32_1 = arith.constant 0 : i32
    return %2, %c0_i32_0 : i32, i32
  }
  func.func @transform_2(%arg0: i32, %arg1: i32) -> (i32, i32, i32, i32) {
    %c0_i32 = arith.constant 0 : i32
    %c0_i32_0 = arith.constant 0 : i32
    %c0_i32_1 = arith.constant 0 : i32
    %c0_i32_2 = arith.constant 0 : i32
    return %arg0, %c0_i32, %c0_i32_0, %c0_i32_1 : i32, i32, i32, i32
  }
}

</mosaic_0001>

<bundles_post_ra>
// kernel: bce_dice_loss.1
= control target key start
LH: loop header
LB: loop body
LE: loop exit
PB: predicated region body
PF: predicated region fallthrough
CT: control target
= control target key end

     0   :  { %s230_s0 = inlined_call_operand.vmem [shape: f32[16,128], index: 0, kind: input, shape index: {}]   ;;  %s231_s1 = inlined_call_operand.vmem [shape: f32[16,128], index: 1, kind: input, shape index: {}]   ;;  %s232_s2 = inlined_call_operand.vmem [shape: f32[1,4,8,128], index: 2, kind: output, shape index: {}]  }
   0x1   :  { %v83_v0 = vld [vmem:[%s230_s0] sm:$0xff]  ;;  %v84_v1 = vld [vmem:[%s230_s0 + $0x8] sm:$0xff] }
   0x2   :  { %v85_v2 = vld [vmem:[%s231_s1] sm:$0xff]  ;;  %v86_v3 = vld [vmem:[%s231_s1 + $0x8] sm:$0xff]  ;;  %v87_v4 = vand.u32 2147483647, %v83_v0  ;;  %v88_v5 = vand.u32 2147483647, %v84_v1 }
   0x3   :  { %v144_v6 = vadd.f32 %v86_v3, %v85_v2  ;;  %vm95_vm0 = vcmp.ge.f32.partialorder %v83_v0, 0.0  ;;  %vm96_vm1 = vcmp.ge.f32.partialorder %v84_v1, 0.0  ;;  %v107_v17 = vmul.f32 %v85_v2, %v83_v0 }
   0x4   :  { %v89_v7 = vsub.f32 0.0, %v87_v4  ;;  %v90_v8 = vsub.f32 0.0, %v88_v5  ;;  %v105_v20 = vmax.f32 %v83_v0, 0.0  ;;  %v106_v24 = vmax.f32 %v84_v1, 0.0 }
   0x5   :  { %161 = vst [vmem:[%s232_s2 + $0x10] sm:$0xff] %v144_v6  ;;  %v108_v25 = vmul.f32 %v86_v3, %v84_v1 }
   0x6   :  { %v91_v9 = vmul.f32 1.442695, %v89_v7  ;;  %v93_v10 = vmul.f32 1.442695, %v90_v8  ;;  %v109_v33 = vsub.f32 %v105_v20, %v107_v17 }
   0x7   :  { %v110_v37 = vsub.f32 %v106_v24, %v108_v25 }
   0x8   :  { %179 = vpow2.f32 %v91_v9 }
   0x9   :  { %181 = vpow2.f32 %v93_v10 }
  0x12   :  { %v180_v11 = vpop.eup %179 }
  0x13   :  { %v182_v12 = vpop.eup %181  ;;  %v99_v13 = vadd.f32 1.0, %v180_v11  ;;  %v114_v15 = vmul.f32 -0.5, %v180_v11  ;;  %v97_v19 = vsel %vm95_vm0, 1.0, %v180_v11  ;;  %v117_v21 = vand.u32 2147483647, %v180_v11 }
  0x14   :  { %v100_v14 = vadd.f32 1.0, %v182_v12  ;;  %v123_v16 = vmul.f32 -0.5, %v182_v12  ;;  %v98_v23 = vsel %vm96_vm1, 1.0, %v182_v12  ;;  %v126_v26 = vand.u32 2147483647, %v182_v12 }
  0x15   :  { %183 = vrcp.f32 %v99_v13  ;;  %v115_v18 = vadd.f32 1.0, %v114_v15  ;;  %vm118_vm2 = vcmp.lt.f32.partialorder %v117_v21, 0.0004427343 }
  0x16   :  { %185 = vrcp.f32 %v100_v14  ;;  %v124_v22 = vadd.f32 1.0, %v123_v16  ;;  %vm127_vm3 = vcmp.lt.f32.partialorder %v126_v26, 0.0004427343 }
  0x17   :  { %187 = vlog2.f32 %v99_v13  ;;  %v116_v30 = vmul.f32 %v180_v11, %v115_v18 }
  0x18   :  { %189 = vlog2.f32 %v100_v14  ;;  %v125_v34 = vmul.f32 %v182_v12, %v124_v22 }
  0x1f   :  { %v184_v27 = vpop.eup %183 }
  0x20   :  { %v186_v28 = vpop.eup %185  ;;  %v102_v29 = vmul.f32 %v184_v27, %v97_v19 }
  0x21   :  { %v188_v31 = vpop.eup %187  ;;  %v104_v32 = vmul.f32 %v186_v28, %v98_v23 }
  0x22   :  { %v190_v35 = vpop.eup %189  ;;  %v132_v36 = vmul.f32 %v102_v29, %v85_v2  ;;  %v113_v38 = vmul.f32 0.6931472, %v188_v31 }
  0x23   :  { %v133_v39 = vmul.f32 %v104_v32, %v86_v3  ;;  %v139_v40 = vadd.f32 %v104_v32, %v102_v29  ;;  %v122_v41 = vmul.f32 0.6931472, %v190_v35 }
  0x24   :  { %v119_v42 = vsel %vm118_vm2, %v116_v30, %v113_v38 }
  0x25   :  { %v134_v43 = vadd.f32 %v133_v39, %v132_v36  ;;  %160 = vst [vmem:[%s232_s2 + $0x8] sm:$0xff] %v139_v40  ;;  %v128_v44 = vsel %vm127_vm3, %v125_v34, %v122_v41  ;;  %v129_v45 = vadd.f32 %v119_v42, %v109_v33 }
  0x26   :  { %v130_v46 = vadd.f32 %v128_v44, %v110_v37 }
  0x27   :  { %159 = vst [vmem:[%s232_s2] sm:$0xff] %v134_v43 }
  0x28   :  { %v149_v47 = vadd.f32 %v130_v46, %v129_v45 }
  0x2a   :  { %162 = vst [vmem:[%s232_s2 + $0x18] sm:$0xff] %v149_v47 }

</bundles_post_ra>
